<compile_context>
chip_gen: v7x
topology: tpu7x:2x2x1
jax: 0.10.0
libtpu: 0.0.40
codegen_flags: <defaults>
</compile_context>

<pallas_src>
import jax
import jax.numpy as jnp
from jax.experimental import pallas as pl
from jax.experimental.pallas import tpu as pltpu


_LANES = 128
_SMALL_N_THRESHOLD = 1 << 16      # below this, jnp.full beats any Pallas launch
_TARGET_BLOCK_BYTES = 2 << 20     # ~2 MiB/block; 2x-buffered = 4 MiB on all gens


def _sublane_pack(dtype) -> int:
    """Native sublane packing for the dtype (keeps tiles / vst / DMA full)."""
    itemsize = jnp.dtype(dtype).itemsize
    if itemsize >= 4:
        return 8
    if itemsize == 2:
        return 16
    return 32                      # int8 / fp8 / bool


def _round_up(x: int, m: int) -> int:
    return ((x + m - 1) // m) * m


def _choose_layout(n: int, pack: int):
    """Lane-dense 2-D slab (rows, width) holding n elements.

    Prefer an exact factorization (rows * width == n, width % 128 == 0,
    rows % pack == 0) so the wrapper reshape is copy-free; otherwise pad.
    """
    for width in (4096, 2048, 1024, 512, 256, 128):
        if n % width == 0:
            rows = n // width
            if rows >= pack and rows % pack == 0:
                return rows, width, True
    width = 1024
    rows = _round_up(pl.cdiv(n, width), pack)
    return rows, width, False


def _fill_kernel(fill_ref, o_ref):
    # fill_ref: (1, 1) 32-bit scalar in SMEM; o_ref: lane-dense VMEM tile.
    o_ref[...] = jnp.full(o_ref.shape, fill_ref[0, 0], dtype=o_ref.dtype)


def full_initializer(w: jax.Array, fill_value, *, force_pallas: bool = False) -> jax.Array:
    """Pallas equivalent of FullInitializer(fill_value)(w) -> (1, N, 1) of w.dtype."""
    n = int(w.shape[0])
    dtype = jnp.dtype(w.dtype)

    # torch.full casting semantics: fill value is cast to the output dtype.
    fill_in_dtype = jnp.asarray(fill_value, dtype)

    if not force_pallas and n < _SMALL_N_THRESHOLD:
        # Launch/grid-step overhead dominates at small N; plain full is faster.
        return jnp.full((1, n, 1), fill_in_dtype, dtype=dtype)

    pack = _sublane_pack(dtype)
    rows, width, exact = _choose_layout(n, pack)
    itemsize = dtype.itemsize

    # ~2 MiB blocks (dtype-aware sublane multiple), double-buffered well under
    # the scoped VMEM defaults (16 MiB v5e, 32 MiB v6e/v7x).
    block_rows = max(pack, (_TARGET_BLOCK_BYTES // (width * itemsize)) // pack * pack)
    # v7x: keep >= 2 parallel blocks when possible so both TCs share writeback.
    if rows >= 2 * pack:
        block_rows = min(block_rows, _round_up(pl.cdiv(rows, 2), pack))
    block_rows = min(block_rows, _round_up(rows, pack))

    num_blocks = pl.cdiv(rows, block_rows)
    padded_rows = rows if exact else num_blocks * block_rows

    # Runtime SMEM scalar carrier (float32/int32); kernel casts to o_ref.dtype.
    carrier = jnp.float32 if jnp.issubdtype(dtype, jnp.floating) else jnp.int32
    fill_arr = fill_in_dtype.astype(carrier).reshape(1, 1)

    out2d = pl.pallas_call(
        _fill_kernel,
        out_shape=jax.ShapeDtypeStruct((padded_rows, width), dtype),
        grid=(num_blocks,),
        in_specs=[pl.BlockSpec(memory_space=pltpu.MemorySpace.SMEM)],
        out_specs=pl.BlockSpec((block_rows, width), lambda i: (i, 0)),
        compiler_params=pltpu.CompilerParams(
            dimension_semantics=("parallel",),
        ),
        cost_estimate=pl.CostEstimate(
            flops=0,
            transcendentals=0,
            bytes_accessed=padded_rows * width * itemsize,
        ),
    )(fill_arr)

    if exact:
        # rows * width == n: contiguous row-major reshape, no HBM copy.
        return out2d.reshape(1, n, 1)
    # Padded fallback (unaligned N): one extra copy of the payload.
    return out2d.reshape(-1)[:n].reshape(1, n, 1)


if __name__ == "__main__":
    key = jax.random.PRNGKey(0)

    # 1) Typical small weight -> fast path (no Pallas launch).
    w = jax.random.normal(key, (4, 16, 16), dtype=jnp.float32)
    out = jax.block_until_ready(full_initializer(w, 0.5))
    ref = jnp.full((1, w.shape[0], 1), 0.5, dtype=w.dtype)
    assert out.shape == (1, 4, 1) and out.dtype == w.dtype
    assert bool(jnp.all(out == ref))

    # 2) Force the Pallas kernel on the same small input (padded-slab path).
    out2 = jax.block_until_ready(full_initializer(w, -3.25, force_pallas=True))
    assert bool(jnp.all(out2 == jnp.full((1, 4, 1), -3.25, w.dtype)))

    # 3) Pallas kernel, exact lane-dense layout (n=2048 -> rows=8, width=256), f32.
    w_big = jnp.zeros((2048, 8), dtype=jnp.float32)
    out3 = jax.block_until_ready(full_initializer(w_big, 1.5, force_pallas=True))
    assert out3.shape == (1, 2048, 1) and out3.dtype == jnp.float32
    assert bool(jnp.all(out3 == jnp.full((1, 2048, 1), 1.5, jnp.float32)))

    # 4) Pallas kernel, bf16 (dtype-aware sublane pack=16; exact layout).
    w_bf16 = jnp.zeros((4096,), dtype=jnp.bfloat16)
    out4 = jax.block_until_ready(full_initializer(w_bf16, 0.25, force_pallas=True))
    assert out4.shape == (1, 4096, 1) and out4.dtype == jnp.bfloat16
    assert bool(jnp.all(out4 == jnp.full((1, 4096, 1), 0.25, jnp.bfloat16)))

    print("KERNEL_OK")
</pallas_src>

<mosaic_0001>
module attributes {stable_mosaic.version = 11 : i64} {
  func.func @_fill_kernel(%arg0: i32, %arg1: memref<1x1xf32, #tpu.memory_space<smem>>, %arg2: memref<8x1024xf32, #tpu.memory_space<vmem>>) attributes {dimension_semantics = [#tpu.dimension_semantics<parallel>], iteration_bounds = array<i64: 1>, scalar_prefetch = 0 : i64, scratch_operands = 0 : i64, tpu.core_type = #tpu.core_type<tc>, window_params = [{transform_indices = @transform_0, window_bounds = array<i64: 1, 1>}, {transform_indices = @transform_1, window_bounds = array<i64: 8, 1024>}]} {
    %c0 = arith.constant 0 : index
    %c0_0 = arith.constant 0 : index
    %0 = memref.load %arg1[%c0, %c0_0] : memref<1x1xf32, #tpu.memory_space<smem>>
    %1 = vector.broadcast %0 : f32 to vector<8x1024xf32>
    %c0_1 = arith.constant 0 : index
    %c0_2 = arith.constant 0 : index
    %2 = vector.load %arg2[%c0_1, %c0_2] : memref<8x1024xf32, #tpu.memory_space<vmem>>, vector<8x1024xf32>
    tpu.vector_store %arg2[%c0_1, %c0_2], %1 {strides = array<i32>} : memref<8x1024xf32, #tpu.memory_space<vmem>>, vector<8x1024xf32>,
    return
  }
  func.func @transform_0(%arg0: i32) -> (i32, i32) {
    %c0_i32 = arith.constant 0 : i32
    %c0_i32_0 = arith.constant 0 : i32
    %c0_i32_1 = arith.constant 0 : i32
    return %c0_i32, %c0_i32_0 : i32, i32
  }
  func.func @transform_1(%arg0: i32) -> (i32, i32) {
    %c0_i32 = arith.constant 0 : i32
    %c0_i32_0 = arith.constant 0 : i32
    return %arg0, %c0_i32 : i32, i32
  }
}

</mosaic_0001>

<bundles_post_ra>
// kernel: tpu_custom_call.1
= control target key start
LH: loop header
LB: loop body
LE: loop exit
PB: predicated region body
PF: predicated region fallthrough
CT: control target
= control target key end

     0   :  { %s85_s0 = inlined_call_operand.<no memory space> [shape: f32[1,1], index: 0, kind: input, shape index: {}]   ;;  %s86_s1 = inlined_call_operand.hbm [shape: f32[8,1024], index: 1, kind: output, shape index: {}]  }
   0x1   :  { %v11_v0 = vstv %s85_s0 }
   0x2   :  { %7 = vsyncpa [#allocation4], 0  ;;  %12 = vst [vmem:[#allocation3] sm:$0xff] %v11_v0  ;;  %s59_s8 = smov [#allocation3]  }
   0x3   :  { %13 = vst [vmem:[#allocation3 + $0x8] sm:$0xff] %v11_v0  ;;  %14 = vst [vmem:[#allocation3 + $0x10] sm:$0xff] %v11_v0  ;;  %s26_s9 = sshll.u32 %s59_s8, 4  ;;  %s27_s9 = int_to_ptr.vmem [resolvable:$true] %s26_s9 }
   0x4   :  { %15 = vst [vmem:[#allocation3 + $0x18] sm:$0xff] %v11_v0  ;;  %16 = vst [vmem:[#allocation3 + $0x20] sm:$0xff] %v11_v0  ;;  %s35_s10 = scalar_lea.vmem %s27_s9, 1024  ;;  %p40_p1 = scmp.lt.s32.totalorder %s27_s9, %s27_s9 }
   0x5   :  { %17 = vst [vmem:[#allocation3 + $0x28] sm:$0xff] %v11_v0  ;;  %18 = vst [vmem:[#allocation3 + $0x30] sm:$0xff] %v11_v0  ;;  %p36_p0 = scmp.ne.s32.totalorder %s27_s9, %s35_s10  ;;  %p41_p2 = scmp.lt.s32.totalorder %s35_s10, %s35_s10 }
   0x6   :  { %19 = vst [vmem:[#allocation3 + $0x38] sm:$0xff] %v11_v0 }
   0x7   :  { %p42_p3 = por %p41_p2, %p40_p1 }
   0x9   :  { %p43_p4 = pnand %p42_p3, %p36_p0 }
   0xb   :  { %46 = shalt.err (!%p43_p4)
}
   0xc   :  { %s47_s12 = scalar_lea.hbm %s86_s1, 1024 }
   0xd   :  { %p48_p5 = scmp.ne.s32.totalorder %s86_s1, %s47_s12  ;;  %p51_p6 = scmp.lt.u32.totalorder %s47_s12, %s86_s1 }
   0xf   :  { %p53_p7 = pnand %p51_p6, %p48_p5 }
  0x11   :  { %56 = shalt.err (!%p53_p7)
}
  0x12   :  { %29 = dma.vmem_to_hbm [thread:$0]  %s27_s9, 1024, %s86_s1, [#allocation4]  }
  0x13   :  { %57 = dma.done.wait [#allocation4], 1024  }
  0x14   :  { %58 = vsyncadd [#allocation4], 4294966272 }
  0x15   :  { %33 = vsyncpa [#allocation4], 1 }

</bundles_post_ra>
